<compile_context>
chip_gen: v5e
topology: v5e:2x2
jax: 0.10.0
libtpu: 0.0.40
codegen_flags: <defaults>
</compile_context>

<pallas_src>
import jax
import jax.numpy as jnp
from jax.experimental import pallas as pl
from jax.experimental.pallas import tpu as pltpu

DIM = 32   # self.dim
D = 7      # self.D
N = 1      # self.N (torch forward only uses xArr[1], hArr[0] when N == 1)
PAD = ((D * DIM + 127) // 128) * 128   # 224 -> 256, lane-aligned width


def nn2_kernel(t0_ref, pc_ref, w_ref, b_ref, out_ref):
    """One batch tile per grid step (everything VMEM resident).

    t0_ref : (TB, inputDim)  f32   flattened inputs for this batch tile
    pc_ref : (inputDim, 2*PAD) bf16  [projX1 (zero-padded) | projV·h broadcast (zero-padded)]
    w_ref  : (PAD, nTokens) bf16   contextVecToProbabilityVec, zero-padded rows
    b_ref  : (1, nTokens)   f32    bias
    out_ref: (TB, nTokens)  f32
    """
    t0 = t0_ref[...].astype(jnp.bfloat16)
    # One fused MXU push for both projections (f32 accumulation).
    z = jnp.dot(t0, pc_ref[...], preferred_element_type=jnp.float32)   # (TB, 2*PAD)
    x1 = z[:, :PAD]          # flattened x1 (padded lanes are exactly zero)
    scale = z[:, PAD:]       # conv_t scalar, pre-broadcast over each DIM-wide block
    y = (x1 * scale).astype(jnp.bfloat16)                              # padded lanes stay zero
    # One MXU push for the readout.
    out_ref[...] = jnp.dot(y, w_ref[...], preferred_element_type=jnp.float32) + b_ref[...]


def prepare_params(params, inputDim, nTokens):
    """One-time host-side folding / padding / bf16-casting of frozen parameters."""
    projX1, projV, h, W, bias = params

    # Fold h into projV:  conv_t = sum_k h[t,k] * (t0 @ projV)[t*DIM+k]
    #                           = t0 @ PVH[:, t],  PVH[j,t] = sum_k projV[j, t*DIM+k] * h[t,k]
    pvh = jnp.einsum("jtk,tk->jt", projV.reshape(inputDim, D, DIM), h)      # (inputDim, D)
    # Pre-broadcast the per-t scalar across its DIM-wide block of the flat layout.
    pvs = jnp.repeat(pvh, DIM, axis=1)                                      # (inputDim, D*DIM)

    # Zero-pad 224-wide axes to PAD (=256) so kernel lane slices are 128-aligned.
    px_pad = jnp.zeros((inputDim, PAD), jnp.float32).at[:, : D * DIM].set(projX1)
    pvs_pad = jnp.zeros((inputDim, PAD), jnp.float32).at[:, : D * DIM].set(pvs)
    pc = jnp.concatenate([px_pad, pvs_pad], axis=1).astype(jnp.bfloat16)    # (inputDim, 2*PAD)

    w_pad = (jnp.zeros((PAD, nTokens), jnp.float32)
             .at[: D * DIM, :].set(W)).astype(jnp.bfloat16)                 # (PAD, nTokens)
    b2 = bias.reshape(1, nTokens).astype(jnp.float32)
    return pc, w_pad, b2


def _round_up(x, m):
    return ((x + m - 1) // m) * m


def nn2_forward(xIn, prepped, *, max_tb=256):
    """JAX wrapper.

    xIn: (ctxLen, embeddingDim) single sample (matches torch forward) or
         (B, ctxLen, embeddingDim) batch.
    """
    pc, w_pad, b2 = prepped
    inputDim = pc.shape[0]
    nTokens = w_pad.shape[-1]

    single = (xIn.ndim == 2)
    xb = xIn[None] if single else xIn
    B = xb.shape[0]
    t0 = xb.reshape(B, inputDim).astype(jnp.float32)

    # Batch tile: at least one f32 sublane tile (8 rows), at most max_tb MXU rows.
    TB = min(max_tb, _round_up(B, 8))
    B_pad = _round_up(B, TB)
    if B_pad != B:
        t0 = jnp.pad(t0, ((0, B_pad - B), (0, 0)))
    n_blocks = B_pad // TB

    flops = 2 * B_pad * (inputDim * 2 * PAD + PAD * nTokens)
    bytes_accessed = (t0.size * 4 + pc.size * 2 + w_pad.size * 2
                      + b2.size * 4 + B_pad * nTokens * 4)

    out = pl.pallas_call(
        nn2_kernel,
        out_shape=jax.ShapeDtypeStruct((B_pad, nTokens), jnp.float32),
        grid=(n_blocks,),
        in_specs=[
            pl.BlockSpec((TB, inputDim), lambda i: (i, 0)),        # t0: per-tile DMA
            pl.BlockSpec((inputDim, 2 * PAD), lambda i: (0, 0)),   # pc: fetched once, resident
            pl.BlockSpec((PAD, nTokens), lambda i: (0, 0)),        # W : fetched once, resident
            pl.BlockSpec((1, nTokens), lambda i: (0, 0)),          # bias: resident
        ],
        out_specs=pl.BlockSpec((TB, nTokens), lambda i: (i, 0)),
        compiler_params=pltpu.CompilerParams(
            dimension_semantics=("parallel",)),                    # megacore / 2-TC sharding
        cost_estimate=pl.CostEstimate(
            flops=flops, transcendentals=0, bytes_accessed=bytes_accessed),
    )(t0, pc, w_pad, b2)

    out = out[:B]
    return out[0] if single else out                               # single -> (nTokens,)


def make_params(key, nTokens, ctxLen, embeddingDim):
    """Deterministic synthetic parameters matching Nn2.__init__ shapes/scales."""
    inputDim = ctxLen * embeddingDim
    ks = jax.random.split(key, 8)

    # projForX[0], self.b, dArr[1], sArr[1], inputEmbeddings exist in the torch
    # module but never influence the output when N == 1 -> not materialized here.
    projX1 = jax.random.uniform(ks[1], (inputDim, D * DIM), jnp.float32) * 0.05
    projV = jax.random.uniform(ks[2], (inputDim, D * DIM), jnp.float32) * 0.05
    a = jax.random.normal(ks[3], (DIM,), jnp.float32) * 0.05          # self.a
    dvec0 = jax.random.normal(ks[4], (DIM,), jnp.float32) * 0.05      # diag of dArr[0]
    W = jax.random.uniform(ks[5], (D * DIM, nTokens), jnp.float32) * 0.5 / 80.0
    bias = jax.random.uniform(ks[6], (nTokens,), jnp.float32) * 0.005

    # updateA(): exp-decay filter window then Toeplitz kernel (makeToeplitzKernel2)
    z = jnp.arange(DIM, dtype=jnp.float32)
    filt = jnp.exp(-z * 0.3) * (1.0 - 0.0005) + 0.0005
    tWindow = a * filt                                                 # (DIM,)
    r = jnp.arange(DIM)[:, None]
    c = jnp.arange(D)[None, :]
    s0 = jnp.where(r >= c, tWindow[jnp.clip(r - c, 0, DIM - 1)], 0.0)  # (DIM, D)
    # hArr[0] = transpose(dArr[0] @ sArr[0]) -> h[t, k] = dvec0[k] * s0[k, t]
    h = (dvec0[:, None] * s0).T                                        # (D, DIM)

    return projX1, projV, h.astype(jnp.float32), W, bias


def ref_forward(xIn, params):
    """Pure-JAX f32 reference reproducing the torch forward for N == 1."""
    projX1, projV, h, W, bias = params
    single = (xIn.ndim == 2)
    xb = xIn[None] if single else xIn
    B = xb.shape[0]
    t0 = xb.reshape(B, -1)
    x1 = (t0 @ projX1).reshape(B, D, DIM)
    v = (t0 @ projV).reshape(B, D, DIM)
    conv = jnp.sum(h[None] * v, axis=-1, keepdims=True)   # per-t scalar  h[t] . v[t]
    v_new = x1 * conv                                     # v_t <- x1_t * scalar
    out = v_new.reshape(B, -1) @ W + bias
    return out[0] if single else out


if __name__ == "__main__":
    nTokens, ctxLen, embeddingDim = 256, 8, 32      # inputDim = 256
    B = 16                                          # batched regime (>= one sublane tile)
    key = jax.random.PRNGKey(0)
    kx, kb, kp = jax.random.split(key, 3)

    params = make_params(kp, nTokens, ctxLen, embeddingDim)
    prepped = prepare_params(params, ctxLen * embeddingDim, nTokens)

    # Batched path (the regime the kernel is optimized for).
    xBatch = jax.random.uniform(kb, (B, ctxLen, embeddingDim), dtype=jnp.float32)
    outB = nn2_forward(xBatch, prepped)
    jax.block_until_ready(outB)
    refB = ref_forward(xBatch, params)
    assert outB.shape == (B, nTokens)
    # Tolerance relaxed vs pure-f32 because weights/matmuls are bf16 (f32 accumulation).
    assert jnp.allclose(outB, refB, rtol=3e-2, atol=4e-3), "batched kernel != reference"

    # Single-sample path (matches the torch module forward exactly).
    xIn = jax.random.uniform(kx, (ctxLen, embeddingDim), dtype=jnp.float32)
    out1 = nn2_forward(xIn, prepped)
    jax.block_until_ready(out1)
    ref1 = ref_forward(xIn, params)
    assert out1.shape == (nTokens,)
    assert jnp.allclose(out1, ref1, rtol=3e-2, atol=4e-3), "single-sample kernel != reference"

    print("KERNEL_OK")
</pallas_src>

<mosaic_0001>
module attributes {stable_mosaic.version = 11 : i64} {
  func.func @nn2_kernel(%arg0: i32, %arg1: memref<16x256xf32, #tpu.memory_space<vmem>>, %arg2: memref<256x512xbf16, #tpu.memory_space<vmem>>, %arg3: memref<256x256xbf16, #tpu.memory_space<vmem>>, %arg4: memref<1x256xf32, #tpu.memory_space<vmem>>, %arg5: memref<16x256xf32, #tpu.memory_space<vmem>>) attributes {dimension_semantics = [#tpu.dimension_semantics<parallel>], iteration_bounds = array<i64: 1>, scalar_prefetch = 0 : i64, scratch_operands = 0 : i64, tpu.core_type = #tpu.core_type<tc>, window_params = [{transform_indices = @transform_0, window_bounds = array<i64: 16, 256>}, {pipeline_mode = #tpu.pipeline_mode<synchronous>, transform_indices = @transform_1, window_bounds = array<i64: 256, 512>}, {pipeline_mode = #tpu.pipeline_mode<synchronous>, transform_indices = @transform_2, window_bounds = array<i64: 256, 256>}, {pipeline_mode = #tpu.pipeline_mode<synchronous>, transform_indices = @transform_3, window_bounds = array<i64: 1, 256>}, {transform_indices = @transform_4, window_bounds = array<i64: 16, 256>}]} {
    %c0 = arith.constant 0 : index
    %c0_0 = arith.constant 0 : index
    %0 = vector.load %arg1[%c0, %c0_0] : memref<16x256xf32, #tpu.memory_space<vmem>>, vector<16x256xf32>
    %1 = arith.truncf %0 : vector<16x256xf32> to vector<16x256xbf16>
    %c0_1 = arith.constant 0 : index
    %c0_2 = arith.constant 0 : index
    %2 = vector.load %arg2[%c0_1, %c0_2] : memref<256x512xbf16, #tpu.memory_space<vmem>>, vector<256x512xbf16>
    %cst = arith.constant dense<0.000000e+00> : vector<16x512xf32>
    %3 = tpu.matmul %1, %2, %cst {dimension_numbers = #tpu.dot_dimension_numbers<[1], [0], [0], [1], [0, 0, 1, 1], [], []>} : vector<16x256xbf16>, vector<256x512xbf16>, vector<16x512xf32> -> vector<16x512xf32>
    %4 = vector.extract_strided_slice %3 {offsets = [0, 0], sizes = [16, 256], strides = [1, 1]} : vector<16x512xf32> to vector<16x256xf32>
    %5 = vector.extract_strided_slice %3 {offsets = [0, 256], sizes = [16, 256], strides = [1, 1]} : vector<16x512xf32> to vector<16x256xf32>
    %6 = arith.mulf %4, %5 : vector<16x256xf32>
    %7 = arith.truncf %6 : vector<16x256xf32> to vector<16x256xbf16>
    %c0_3 = arith.constant 0 : index
    %c0_4 = arith.constant 0 : index
    %8 = vector.load %arg3[%c0_3, %c0_4] : memref<256x256xbf16, #tpu.memory_space<vmem>>, vector<256x256xbf16>
    %cst_5 = arith.constant dense<0.000000e+00> : vector<16x256xf32>
    %9 = tpu.matmul %7, %8, %cst_5 {dimension_numbers = #tpu.dot_dimension_numbers<[1], [0], [0], [1], [0, 0, 1, 1], [], []>} : vector<16x256xbf16>, vector<256x256xbf16>, vector<16x256xf32> -> vector<16x256xf32>
    %c0_6 = arith.constant 0 : index
    %c0_7 = arith.constant 0 : index
    %10 = vector.load %arg4[%c0_6, %c0_7] : memref<1x256xf32, #tpu.memory_space<vmem>>, vector<1x256xf32>
    %11 = vector.broadcast %10 : vector<1x256xf32> to vector<16x256xf32>
    %12 = arith.addf %9, %11 : vector<16x256xf32>
    %c0_8 = arith.constant 0 : index
    %c0_9 = arith.constant 0 : index
    %13 = vector.load %arg5[%c0_8, %c0_9] : memref<16x256xf32, #tpu.memory_space<vmem>>, vector<16x256xf32>
    tpu.vector_store %arg5[%c0_8, %c0_9], %12 {strides = array<i32>} : memref<16x256xf32, #tpu.memory_space<vmem>>, vector<16x256xf32>,
    return
  }
  func.func @transform_0(%arg0: i32) -> (i32, i32) {
    %c0_i32 = arith.constant 0 : i32
    %c0_i32_0 = arith.constant 0 : i32
    return %arg0, %c0_i32 : i32, i32
  }
  func.func @transform_1(%arg0: i32) -> (i32, i32) {
    %c0_i32 = arith.constant 0 : i32
    %c0_i32_0 = arith.constant 0 : i32
    %c0_i32_1 = arith.constant 0 : i32
    return %c0_i32, %c0_i32_0 : i32, i32
  }
  func.func @transform_2(%arg0: i32) -> (i32, i32) {
    %c0_i32 = arith.constant 0 : i32
    %c0_i32_0 = arith.constant 0 : i32
    %c0_i32_1 = arith.constant 0 : i32
    return %c0_i32, %c0_i32_0 : i32, i32
  }
  func.func @transform_3(%arg0: i32) -> (i32, i32) {
    %c0_i32 = arith.constant 0 : i32
    %c0_i32_0 = arith.constant 0 : i32
    %c0_i32_1 = arith.constant 0 : i32
    return %c0_i32, %c0_i32_0 : i32, i32
  }
  func.func @transform_4(%arg0: i32) -> (i32, i32) {
    %c0_i32 = arith.constant 0 : i32
    %c0_i32_0 = arith.constant 0 : i32
    return %arg0, %c0_i32 : i32, i32
  }
}

</mosaic_0001>

<bundles_post_ra>
// kernel: tpu_custom_call.1
= control target key start
LH: loop header
LB: loop body
LE: loop exit
PB: predicated region body
PF: predicated region fallthrough
CT: control target
= control target key end

     0   :  { %9 = vsyncpa [#allocation3], 0  ;;  %s1510_s0 = inlined_call_operand.hbm [shape: f32[16,256], index: 0, kind: input, shape index: {}]   ;;  %s1511_s1 = inlined_call_operand.hbm [shape: bf16[256,512], index: 1, kind: input, shape index: {}]   ;;  %s1512_s2 = inlined_call_operand.hbm [shape: bf16[256,256], index: 2, kind: input, shape index: {}]   ;;  %s1513_s3 = inlined_call_operand.vmem [shape: f32[1,256], index: 3, kind: input, shape index: {}]   ;;  %s1514_s4 = inlined_call_operand.hbm [shape: f32[16,256], index: 4, kind: output, shape index: {}]  }
   0x1   :  { %10 = vsyncpa [#allocation6], 0 }
   0x2   :  { %11 = vsyncpa [#allocation4], 0  ;;  %s29_s17 = sshll.u32 %s1511_s1, 4  ;;  %s1441_s18 = smov [#allocation5]   ;;  %s30_s17 = int_to_ptr.hbm [resolvable:$true] %s29_s17 }
   0x3   :  { %s31_s19 = sshll.u32 %s1441_s18, 4  ;;  %s16_s22 = sshll.u32 %s1510_s0, 4  ;;  %s32_s19 = int_to_ptr.vmem [resolvable:$true] %s31_s19  ;;  %s17_s22 = int_to_ptr.hbm [resolvable:$true] %s16_s22 }
   0x4   :  { %s1442_s23 = smov 256   ;;  %s1443_s24 = smov 16  }
   0x5   :  { %37 = dma.hbm_to_vmem [thread:$0]  %s30_s17, 8192, %s32_s19, [#allocation6], %s1442_s23, %s1442_s23, %s1443_s24  }
   0x6   :  { %s1444_s25 = smov [#allocation2]   ;;  %s42_s1 = sshll.u32 %s1512_s2, 4  ;;  %s43_s1 = int_to_ptr.hbm [resolvable:$true] %s42_s1 }
   0x7   :  { %s18_s26 = sshll.u32 %s1444_s25, 4  ;;  %s1445_s0 = smov [#allocation7]   ;;  %s19_s26 = int_to_ptr.vmem [resolvable:$true] %s18_s26 }
   0x8   :  { %24 = dma.hbm_to_vmem [thread:$0]  %s17_s22, 512, %s19_s26, [#allocation3], %s1442_s23, %s1442_s23, %s1443_s24  }
   0x9   :  { %s44_s29 = sshll.u32 %s1445_s0, 4  ;;  %s1446_s30 = smov 128   ;;  %s45_s29 = int_to_ptr.vmem [resolvable:$true] %s44_s29 }
   0xa   :  { %s1447_s5 = smov 8  }
   0xb   :  { %50 = dma.hbm_to_vmem [thread:$0]  %s43_s1, 4096, %s45_s29, [#allocation6], %s1446_s30, %s1446_s30, %s1447_s5  }
   0xc   :  { %1435 = dma.done.wait [#allocation3], 512  }
   0xd   :  { %1436 = vsyncadd [#allocation3], 4294966784 }
   0xe   :  { %1437 = dma.done.wait [#allocation6], 12288  }
   0xf   :  { %1438 = vsyncadd [#allocation6], 4294955008  ;;  %v965_v0 = vld [vmem:[#allocation5 + $0xe0] sm:$0xf]  ;;  %v1265_v1 = vld [vmem:[#allocation5 + $0xec] sm:$0xf0] }
  0x10   :  { %v1093_v2 = vld [vmem:[#allocation5 + $0x1e0] sm:$0xf]  ;;  %v966_v3 = vor.u32 %v1265_v1, %v965_v0  ;;  %v1297_v4 = vld [vmem:[#allocation5 + $0x1ec] sm:$0xf0]  ;;  %v1263_v5 = vld [vmem:[#allocation5 + $0xe4] sm:$0xf] }
  0x11   :  { %v967_v6 = vld [vmem:[#allocation5 + $0xf0] sm:$0xf0]  ;;  %v1094_v7 = vor.u32 %v1297_v4, %v1093_v2  ;;  %v1295_v9 = vld [vmem:[#allocation5 + $0x1e4] sm:$0xf]  ;;  %v949_v11 = vld [vmem:[#allocation5 + $0xc0] sm:$0xf] }
  0x12   :  { %v970_v8 = vor.u32 %v1263_v5, %v967_v6  ;;  %v1095_v10 = vld [vmem:[#allocation5 + $0x1f0] sm:$0xf0]  ;;  %455 = vmatpush.bf16.msra.mxu0 %v966_v3  ;;  %v1261_v13 = vld [vmem:[#allocation5 + $0xcc] sm:$0xf0]  ;;  %v1077_v14 = vld [vmem:[#allocation5 + $0x1c0] sm:$0xf] }
  0x13   :  { %v1098_v12 = vor.u32 %v1295_v9, %v1095_v10  ;;  %v1293_v15 = vld [vmem:[#allocation5 + $0x1cc] sm:$0xf0]  ;;  %469 = vmatpush.bf16.msra.mxu1 %v1094_v7  ;;  %v950_v16 = vor.u32 %v1261_v13, %v949_v11  ;;  %v1259_v18 = vld [vmem:[#allocation5 + $0xc4] sm:$0xf]  ;;  %v951_v19 = vld [vmem:[#allocation5 + $0xd0] sm:$0xf0] }
  0x14   :  { %483 = vmatpush.bf16.msra.mxu2 %v970_v8  ;;  %v1078_v17 = vor.u32 %v1293_v15, %v1077_v14  ;;  %v1291_v20 = vld [vmem:[#allocation5 + $0x1c4] sm:$0xf]  ;;  %v954_v21 = vor.u32 %v1259_v18, %v951_v19  ;;  %v1079_v22 = vld [vmem:[#allocation5 + $0x1d0] sm:$0xf0]  ;;  %v933_v23 = vld [vmem:[#allocation5 + $0xa0] sm:$0xf] }
  0x15   :  { %497 = vmatpush.bf16.msra.mxu3 %v1098_v12  ;;  %v1257_v24 = vld [vmem:[#allocation5 + $0xac] sm:$0xf0]  ;;  %v1082_v25 = vor.u32 %v1291_v20, %v1079_v22  ;;  %v1061_v26 = vld [vmem:[#allocation5 + $0x1a0] sm:$0xf]  ;;  %v1255_v28 = vld [vmem:[#allocation5 + $0xa4] sm:$0xf] }
  0x16   :  { %v1289_v27 = vld [vmem:[#allocation5 + $0x1ac] sm:$0xf0]  ;;  %456 = vmatpush.bf16.msra.mxu0 %v950_v16  ;;  %v934_v29 = vor.u32 %v1257_v24, %v933_v23  ;;  %v935_v30 = vld [vmem:[#allocation5 + $0xb0] sm:$0xf0]  ;;  %v1287_v31 = vld [vmem:[#allocation5 + $0x1a4] sm:$0xf] }
  0x17   :  { %v1063_v32 = vld [vmem:[#allocation5 + $0x1b0] sm:$0xf0]  ;;  %470 = vmatpush.bf16.msra.mxu1 %v1078_v17  ;;  %v1062_v33 = vor.u32 %v1289_v27, %v1061_v26  ;;  %v938_v34 = vor.u32 %v1255_v28, %v935_v30  ;;  %v917_v35 = vld [vmem:[#allocation5 + $0x80] sm:$0xf]  ;;  %v1253_v36 = vld [vmem:[#allocation5 + $0x8c] sm:$0xf0] }
  0x18   :  { %484 = vmatpush.bf16.msra.mxu2 %v954_v21  ;;  %v1045_v37 = vld [vmem:[#allocation5 + $0x180] sm:$0xf]  ;;  %v1066_v38 = vor.u32 %v1287_v31, %v1063_v32  ;;  %v1285_v39 = vld [vmem:[#allocation5 + $0x18c] sm:$0xf0]  ;;  %v1251_v40 = vld [vmem:[#allocation5 + $0x84] sm:$0xf]  ;;  %v918_v44 = vor.u32 %v1253_v36, %v917_v35 }
  0x19   :  { %498 = vmatpush.bf16.msra.mxu3 %v1082_v25  ;;  %v919_v41 = vld [vmem:[#allocation5 + $0x90] sm:$0xf0]  ;;  %v1283_v42 = vld [vmem:[#allocation5 + $0x184] sm:$0xf]  ;;  %v1046_v45 = vor.u32 %v1285_v39, %v1045_v37  ;;  %v901_v47 = vld [vmem:[#allocation5 + $0x60] sm:$0xf] }
  0x1a   :  { %v1047_v43 = vld [vmem:[#allocation5 + $0x190] sm:$0xf0]  ;;  %457 = vmatpush.bf16.msra.mxu0 %v934_v29  ;;  %v922_v46 = vor.u32 %v1251_v40, %v919_v41  ;;  %v1249_v48 = vld [vmem:[#allocation5 + $0x6c] sm:$0xf0]  ;;  %v1029_v49 = vld [vmem:[#allocation5 + $0x160] sm:$0xf] }
  0x1b   :  { %471 = vmatpush.bf16.msra.mxu1 %v1062_v33  ;;  %v1050_v50 = vor.u32 %v1283_v42, %v1047_v43  ;;  %v1281_v51 = vld [vmem:[#allocation5 + $0x16c] sm:$0xf0]  ;;  %v1247_v52 = vld [vmem:[#allocation5 + $0x64] sm:$0xf]  ;;  %v903_v53 = vld [vmem:[#allocation5 + $0x70] sm:$0xf0]  ;;  %v902_v56 = vor.u32 %v1249_v48, %v901_v47 }
  0x1c   :  { %485 = vmatpush.bf16.msra.mxu2 %v938_v34  ;;  %v1279_v54 = vld [vmem:[#allocation5 + $0x164] sm:$0xf]  ;;  %v1031_v55 = vld [vmem:[#allocation5 + $0x170] sm:$0xf0]  ;;  %v1030_v57 = vor.u32 %v1281_v51, %v1029_v49  ;;  %v906_v58 = vor.u32 %v1247_v52, %v903_v53  ;;  %v885_v59 = vld [vmem:[#allocation5 + $0x40] sm:$0xf] }
  0x1d   :  { %499 = vmatpush.bf16.msra.mxu3 %v1066_v38  ;;  %v1245_v60 = vld [vmem:[#allocation5 + $0x4c] sm:$0xf0]  ;;  %v1013_v61 = vld [vmem:[#allocation5 + $0x140] sm:$0xf]  ;;  %v1034_v62 = vor.u32 %v1279_v54, %v1031_v55  ;;  %v1243_v0 = vld [vmem:[#allocation5 + $0x44] sm:$0xf] }
  0x1e   :  { %458 = vmatpush.bf16.msra.mxu0 %v918_v44  ;;  %v1277_v63 = vld [vmem:[#allocation5 + $0x14c] sm:$0xf0]  ;;  %v887_v1 = vld [vmem:[#allocation5 + $0x50] sm:$0xf0]  ;;  %v1275_v2 = vld [vmem:[#allocation5 + $0x144] sm:$0xf]  ;;  %v886_v4 = vor.u32 %v1245_v60, %v885_v59 }
  0x1f   :  { %472 = vmatpush.bf16.msra.mxu1 %v1046_v45  ;;  %v1015_v3 = vld [vmem:[#allocation5 + $0x150] sm:$0xf0]  ;;  %v1014_v5 = vor.u32 %v1277_v63, %v1013_v61  ;;  %v890_v6 = vor.u32 %v1243_v0, %v887_v1  ;;  %v869_v7 = vld [vmem:[#allocation5 + $0x20] sm:$0xf]  ;;  %v1241_v8 = vld [vmem:[#allocation5 + $0x2c] sm:$0xf0] }
  0x20   :  { %486 = vmatpush.bf16.msra.mxu2 %v922_v46  ;;  %v997_v9 = vld [vmem:[#allocation5 + $0x120] sm:$0xf]  ;;  %v1018_v10 = vor.u32 %v1275_v2, %v1015_v3  ;;  %v1273_v11 = vld [vmem:[#allocation5 + $0x12c] sm:$0xf0]  ;;  %v1239_v12 = vld [vmem:[#allocation5 + $0x24] sm:$0xf]  ;;  %v870_v16 = vor.u32 %v1241_v8, %v869_v7 }
  0x21   :  { %500 = vmatpush.bf16.msra.mxu3 %v1050_v50  ;;  %v871_v13 = vld [vmem:[#allocation5 + $0x30] sm:$0xf0]  ;;  %v1271_v14 = vld [vmem:[#allocation5 + $0x124] sm:$0xf]  ;;  %v853_v17 = vld [vmem:[#allocation5] sm:$0xf]  ;;  %v998_v20 = vor.u32 %v1273_v11, %v997_v9 }
  0x22   :  { %459 = vmatpush.bf16.msra.mxu0 %v902_v56  ;;  %v999_v15 = vld [vmem:[#allocation5 + $0x130] sm:$0xf0]  ;;  %v1237_v18 = vld [vmem:[#allocation5 + $0xc] sm:$0xf0]  ;;  %v981_v19 = vld [vmem:[#allocation5 + $0x100] sm:$0xf]  ;;  %v874_v21 = vor.u32 %v1239_v12, %v871_v13 }
  0x23   :  { %473 = vmatpush.bf16.msra.mxu1 %v1030_v57  ;;  %v1269_v22 = vld [vmem:[#allocation5 + $0x10c] sm:$0xf0]  ;;  %v1235_v23 = vld [vmem:[#allocation5 + $0x4] sm:$0xf]  ;;  %v855_v24 = vld [vmem:[#allocation5 + $0x10] sm:$0xf0]  ;;  %v1002_v25 = vor.u32 %v1271_v14, %v999_v15  ;;  %v854_v32 = vor.u32 %v1237_v18, %v853_v17 }
  0x24   :  { %487 = vmatpush.bf16.msra.mxu2 %v906_v58  ;;  %v1267_v26 = vld [vmem:[#allocation5 + $0x104] sm:$0xf]  ;;  %v983_v27 = vld [vmem:[#allocation5 + $0x110] sm:$0xf0]  ;;  %v973_v28 = vld [vmem:[#allocation5 + $0xe8] sm:$0xf]  ;;  %v982_v36 = vor.u32 %v1269_v22, %v981_v19  ;;  %v858_v37 = vor.u32 %v1235_v23, %v855_v24 }
  0x25   :  { %501 = vmatpush.bf16.msra.mxu3 %v1034_v62  ;;  %v1266_v29 = vld [vmem:[#allocation5 + $0xf4] sm:$0xf0]  ;;  %v1101_v30 = vld [vmem:[#allocation5 + $0x1e8] sm:$0xf]  ;;  %v1264_v33 = vld [vmem:[#allocation5 + $0xec] sm:$0xf]  ;;  %v986_v41 = vor.u32 %v1267_v26, %v983_v27 }
  0x26   :  { %460 = vmatpush.bf16.msra.mxu0 %v886_v4  ;;  %v1298_v31 = vld [vmem:[#allocation5 + $0x1f4] sm:$0xf0]  ;;  %v975_v34 = vld [vmem:[#allocation5 + $0xf8] sm:$0xf0]  ;;  %v1296_v35 = vld [vmem:[#allocation5 + $0x1ec] sm:$0xf]  ;;  %v974_v42 = vor.u32 %v1266_v29, %v973_v28 }
  0x27   :  { %474 = vmatpush.bf16.msra.mxu1 %v1014_v5  ;;  %v1103_v38 = vld [vmem:[#allocation5 + $0x1f8] sm:$0xf0]  ;;  %v65_v39 = vld [vmem:[#allocation2] sm:$0xff]  ;;  %v67_v40 = vld [vmem:[#allocation2 + $0x10] sm:$0xff]  ;;  %v1102_v45 = vor.u32 %v1298_v31, %v1101_v30  ;;  %v978_v46 = vor.u32 %v1264_v33, %v975_v34  ;;  %s1448_s7 = smov [#allocation8]   ;;  %s837_s10 = sshll.u32 %s1514_s4, 4  ;;  %s838_s10 = int_to_ptr.hbm [resolvable:$true] %s837_s10 }
  0x28   :  { %488 = vmatpush.bf16.msra.mxu2 %v890_v6  ;;  %v66_v43 = vld [vmem:[#allocation2 + $0x8] sm:$0xff]  ;;  %v68_v44 = vld [vmem:[#allocation2 + $0x18] sm:$0xff]  ;;  %v1106_v50 = vor.u32 %v1296_v35, %v1103_v38  ;;  %v1489_v54 = vpack.c.bf16 %v67_v40, %v65_v39 }
  0x29   :  { %502 = vmatpush.bf16.msra.mxu3 %v1018_v10  ;;  %v957_v47 = vld [vmem:[#allocation5 + $0xc8] sm:$0xf]  ;;  %v1262_v48 = vld [vmem:[#allocation5 + $0xd4] sm:$0xf0]  ;;  %v1260_v52 = vld [vmem:[#allocation5 + $0xcc] sm:$0xf]  ;;  %v1491_v57 = vpack.c.bf16 %v68_v44, %v66_v43 }
  0x2a   :  { %461 = vmatpush.bf16.msra.mxu0 %v870_v16  ;;  %v1085_v49 = vld [vmem:[#allocation5 + $0x1c8] sm:$0xf]  ;;  %v1294_v51 = vld [vmem:[#allocation5 + $0x1d4] sm:$0xf0]  ;;  %v959_v53 = vld [vmem:[#allocation5 + $0xd8] sm:$0xf0]  ;;  %v958_v58 = vor.u32 %v1262_v48, %v957_v47 }
  0x2b   :  { %475 = vmatpush.bf16.msra.mxu1 %v998_v20  ;;  %v1292_v55 = vld [vmem:[#allocation5 + $0x1cc] sm:$0xf]  ;;  %v1087_v56 = vld [vmem:[#allocation5 + $0x1d8] sm:$0xf0]  ;;  %v1086_v59 = vor.u32 %v1294_v51, %v1085_v49  ;;  %v962_v60 = vor.u32 %v1260_v52, %v959_v53  ;;  %v941_v61 = vld [vmem:[#allocation5 + $0xa8] sm:$0xf] }
  0x2c   :  { %489 = vmatpush.bf16.msra.mxu2 %v874_v21  ;;  %v1258_v62 = vld [vmem:[#allocation5 + $0xb4] sm:$0xf0]  ;;  %v1069_v63 = vld [vmem:[#allocation5 + $0x1a8] sm:$0xf]  ;;  %v1090_v0 = vor.u32 %v1292_v55, %v1087_v56  ;;  %v1256_v2 = vld [vmem:[#allocation5 + $0xac] sm:$0xf] }
  0x2d   :  { %503 = vmatpush.bf16.msra.mxu3 %v1002_v25  ;;  %v1290_v1 = vld [vmem:[#allocation5 + $0x1b4] sm:$0xf0]  ;;  %v943_v3 = vld [vmem:[#allocation5 + $0xb8] sm:$0xf0]  ;;  %v1288_v4 = vld [vmem:[#allocation5 + $0x1ac] sm:$0xf]  ;;  %v942_v6 = vor.u32 %v1258_v62, %v941_v61 }
  0x2e   :  { %462 = vmatpush.bf16.msra.mxu0 %v854_v32  ;;  %v1071_v5 = vld [vmem:[#allocation5 + $0x1b8] sm:$0xf0]  ;;  %v1070_v7 = vor.u32 %v1290_v1, %v1069_v63  ;;  %v946_v8 = vor.u32 %v1256_v2, %v943_v3  ;;  %v925_v9 = vld [vmem:[#allocation5 + $0x88] sm:$0xf]  ;;  %v1254_v10 = vld [vmem:[#allocation5 + $0x94] sm:$0xf0] }
  0x2f   :  { %476 = vmatpush.bf16.msra.mxu1 %v982_v36  ;;  %v1053_v11 = vld [vmem:[#allocation5 + $0x188] sm:$0xf]  ;;  %v1074_v12 = vor.u32 %v1288_v4, %v1071_v5  ;;  %v1286_v13 = vld [vmem:[#allocation5 + $0x194] sm:$0xf0]  ;;  %v1252_v14 = vld [vmem:[#allocation5 + $0x8c] sm:$0xf]  ;;  %v926_v18 = vor.u32 %v1254_v10, %v925_v9 }
  0x30   :  { %490 = vmatpush.bf16.msra.mxu2 %v858_v37  ;;  %v927_v15 = vld [vmem:[#allocation5 + $0x98] sm:$0xf0]  ;;  %v1284_v16 = vld [vmem:[#allocation5 + $0x18c] sm:$0xf]  ;;  %v1054_v19 = vor.u32 %v1286_v13, %v1053_v11  ;;  %v909_v21 = vld [vmem:[#allocation5 + $0x68] sm:$0xf] }
  0x31   :  { %504 = vmatpush.bf16.msra.mxu3 %v986_v41  ;;  %463 = vmatmul.bf16.vlgmr.msra.gmra.mxu0 %v1489_v54  ;;  %v1055_v17 = vld [vmem:[#allocation5 + $0x198] sm:$0xf0]  ;;  %v930_v20 = vor.u32 %v1252_v14, %v927_v15  ;;  %v1250_v22 = vld [vmem:[#allocation5 + $0x74] sm:$0xf0]  ;;  %v1037_v23 = vld [vmem:[#allocation5 + $0x168] sm:$0xf] }
  0x32   :  { %511 = vmatpush.bf16.msrb.mxu0 %v974_v42  ;;  %477 = vmatmul.bf16.vlgmr.msra.gmra.mxu1 %v1491_v57  ;;  %v1058_v24 = vor.u32 %v1284_v16, %v1055_v17  ;;  %v1282_v25 = vld [vmem:[#allocation5 + $0x174] sm:$0xf0]  ;;  %v1248_v26 = vld [vmem:[#allocation5 + $0x6c] sm:$0xf]  ;;  %v911_v27 = vld [vmem:[#allocation5 + $0x78] sm:$0xf0]  ;;  %v910_v30 = vor.u32 %v1250_v22, %v909_v21 }
  0x33   :  { %525 = vmatpush.bf16.msrb.mxu1 %v1102_v45  ;;  %491 = vmatmul.bf16.vlgmr.msra.gmra.mxu2 %v1489_v54  ;;  %v1280_v28 = vld [vmem:[#allocation5 + $0x16c] sm:$0xf]  ;;  %v1039_v29 = vld [vmem:[#allocation5 + $0x178] sm:$0xf0]  ;;  %v1038_v31 = vor.u32 %v1282_v25, %v1037_v23  ;;  %v914_v32 = vor.u32 %v1248_v26, %v911_v27  ;;  %v893_v33 = vld [vmem:[#allocation5 + $0x48] sm:$0xf] }
  0x34   :  { %539 = vmatpush.bf16.msrb.mxu2 %v978_v46  ;;  %505 = vmatmul.bf16.vlgmr.msra.gmra.mxu3 %v1491_v57  ;;  %v1246_v34 = vld [vmem:[#allocation5 + $0x54] sm:$0xf0]  ;;  %v1021_v35 = vld [vmem:[#allocation5 + $0x148] sm:$0xf]  ;;  %v1042_v36 = vor.u32 %v1280_v28, %v1039_v29  ;;  %v1244_v38 = vld [vmem:[#allocation5 + $0x4c] sm:$0xf] }
  0x35   :  { %553 = vmatpush.bf16.msrb.mxu3 %v1106_v50  ;;  %v1278_v37 = vld [vmem:[#allocation5 + $0x154] sm:$0xf0]  ;;  %v895_v39 = vld [vmem:[#allocation5 + $0x58] sm:$0xf0]  ;;  %v1276_v40 = vld [vmem:[#allocation5 + $0x14c] sm:$0xf]  ;;  %v894_v42 = vor.u32 %v1246_v34, %v893_v33 }
  0x36   :  { %512 = vmatpush.bf16.msrb.mxu0 %v958_v58  ;;  %v1023_v41 = vld [vmem:[#allocation5 + $0x158] sm:$0xf0]  ;;  %v1022_v43 = vor.u32 %v1278_v37, %v1021_v35  ;;  %v898_v44 = vor.u32 %v1244_v38, %v895_v39  ;;  %v877_v45 = vld [vmem:[#allocation5 + $0x28] sm:$0xf]  ;;  %v1242_v46 = vld [vmem:[#allocation5 + $0x34] sm:$0xf0] }
  0x37   :  { %526 = vmatpush.bf16.msrb.mxu1 %v1086_v59  ;;  %v1005_v47 = vld [vmem:[#allocation5 + $0x128] sm:$0xf]  ;;  %v1026_v48 = vor.u32 %v1276_v40, %v1023_v41  ;;  %v1274_v49 = vld [vmem:[#allocation5 + $0x134] sm:$0xf0]  ;;  %v1240_v50 = vld [vmem:[#allocation5 + $0x2c] sm:$0xf]  ;;  %v878_v55 = vor.u32 %v1242_v46, %v877_v45 }
  0x38   :  { %540 = vmatpush.bf16.msrb.mxu2 %v962_v60  ;;  %v879_v51 = vld [vmem:[#allocation5 + $0x38] sm:$0xf0]  ;;  %v1272_v52 = vld [vmem:[#allocation5 + $0x12c] sm:$0xf]  ;;  %v1006_v56 = vor.u32 %v1274_v49, %v1005_v47  ;;  %v861_v59 = vld [vmem:[#allocation5 + $0x8] sm:$0xf] }
  0x39   :  { %554 = vmatpush.bf16.msrb.mxu3 %v1090_v0  ;;  %v1007_v53 = vld [vmem:[#allocation5 + $0x138] sm:$0xf0]  ;;  %v882_v58 = vor.u32 %v1240_v50, %v879_v51  ;;  %v1238_v60 = vld [vmem:[#allocation5 + $0x14] sm:$0xf0]  ;;  %v989_v61 = vld [vmem:[#allocation5 + $0x108] sm:$0xf] }
  0x3a   :  { %513 = vmatpush.bf16.msrb.mxu0 %v942_v6  ;;  %v1010_v62 = vor.u32 %v1272_v52, %v1007_v53  ;;  %v1270_v63 = vld [vmem:[#allocation5 + $0x114] sm:$0xf0]  ;;  %v1236_v0 = vld [vmem:[#allocation5 + $0xc] sm:$0xf]  ;;  %v863_v1 = vld [vmem:[#allocation5 + $0x18] sm:$0xf0]  ;;  %v862_v4 = vor.u32 %v1238_v60, %v861_v59 }
  0x3b   :  { %527 = vmatpush.bf16.msrb.mxu1 %v1070_v7  ;;  %v1268_v2 = vld [vmem:[#allocation5 + $0x10c] sm:$0xf]  ;;  %v991_v3 = vld [vmem:[#allocation5 + $0x118] sm:$0xf0]  ;;  %v990_v5 = vor.u32 %v1270_v63, %v989_v61  ;;  %v866_v6 = vor.u32 %v1236_v0, %v863_v1  ;;  %v1314_v9 = vld [vmem:[#allocation7 + $0x74] sm:$0xf0] }
  0x3c   :  { %541 = vmatpush.bf16.msrb.mxu2 %v946_v8  ;;  %v994_v7 = vor.u32 %v1268_v2, %v991_v3  ;;  %v1165_v8 = vld [vmem:[#allocation7 + $0x70] sm:$0xf]  ;;  %v1313_v10 = vld [vmem:[#allocation7 + $0x74] sm:$0xf]  ;;  %v1157_v14 = vld [vmem:[#allocation7 + $0x60] sm:$0xf] }
  0x3d   :  { %555 = vmatpush.bf16.msrb.mxu3 %v1074_v12  ;;  %v1166_v11 = vor.u32 %v1314_v9, %v1165_v8  ;;  %v1167_v12 = vld [vmem:[#allocation7 + $0x78] sm:$0xf0]  ;;  %v1312_v15 = vld [vmem:[#allocation7 + $0x64] sm:$0xf0]  ;;  %v1311_v16 = vld [vmem:[#allocation7 + $0x64] sm:$0xf] }
  0x3e   :  { %514 = vmatpush.bf16.msrb.mxu0 %v926_v18  ;;  %v1170_v13 = vor.u32 %v1313_v10, %v1167_v12  ;;  %v1158_v17 = vor.u32 %v1312_v15, %v1157_v14  ;;  %v1159_v18 = vld [vmem:[#allocation7 + $0x68] sm:$0xf0]  ;;  %v1329_v21 = vld [vmem:[#allocation7 + $0xf4] sm:$0xf]  ;;  %v1231_v22 = vld [vmem:[#allocation7 + $0xf8] sm:$0xf0] }
  0x3f   :  { %528 = vmatpush.bf16.msrb.mxu1 %v1054_v19  ;;  %v1162_v19 = vor.u32 %v1311_v16, %v1159_v18  ;;  %v1149_v23 = vld [vmem:[#allocation7 + $0x50] sm:$0xf]  ;;  %v1234_v25 = vor.u32 %v1329_v21, %v1231_v22  ;;  %v1309_v27 = vld [vmem:[#allocation7 + $0x54] sm:$0xf]  ;;  %v1151_v28 = vld [vmem:[#allocation7 + $0x58] sm:$0xf0] }
  0x40   :  { %542 = vmatpush.bf16.msrb.mxu2 %v930_v20  ;;  %v1229_v20 = vld [vmem:[#allocation7 + $0xf0] sm:$0xf]  ;;  %v1221_v29 = vld [vmem:[#allocation7 + $0xe0] sm:$0xf]  ;;  %v1223_v33 = vld [vmem:[#allocation7 + $0xe8] sm:$0xf0] }
  0x41   :  { %556 = vmatpush.bf16.msrb.mxu3 %v1058_v24  ;;  %v1310_v24 = vld [vmem:[#allocation7 + $0x54] sm:$0xf0]  ;;  %v1308_v37 = vld [vmem:[#allocation7 + $0x44] sm:$0xf0]  ;;  %v1307_v38 = vld [vmem:[#allocation7 + $0x44] sm:$0xf] }
  0x42   :  { %515 = vmatpush.bf16.msrb.mxu0 %v910_v30  ;;  %v1150_v26 = vor.u32 %v1310_v24, %v1149_v23  ;;  %v1154_v30 = vor.u32 %v1309_v27, %v1151_v28  ;;  %v1143_v40 = vld [vmem:[#allocation7 + $0x48] sm:$0xf0]  ;;  %v1213_v41 = vld [vmem:[#allocation7 + $0xd0] sm:$0xf]  ;;  %v1215_v45 = vld [vmem:[#allocation7 + $0xd8] sm:$0xf0] }
  0x43   :  { %529 = vmatpush.bf16.msrb.mxu1 %v1038_v31  ;;  %v1328_v31 = vld [vmem:[#allocation7 + $0xe4] sm:$0xf0]  ;;  %v1306_v49 = vld [vmem:[#allocation7 + $0x34] sm:$0xf0]  ;;  %v1305_v50 = vld [vmem:[#allocation7 + $0x34] sm:$0xf] }
  0x44   :  { %543 = vmatpush.bf16.msrb.mxu2 %v914_v32  ;;  %v1327_v32 = vld [vmem:[#allocation7 + $0xe4] sm:$0xf]  ;;  %v1222_v34 = vor.u32 %v1328_v31, %v1221_v29  ;;  %v1135_v52 = vld [vmem:[#allocation7 + $0x38] sm:$0xf0]  ;;  %v1207_v60 = vld [vmem:[#allocation7 + $0xc8] sm:$0xf0] }
  0x45   :  { %557 = vmatpush.bf16.msrb.mxu3 %v1042_v36  ;;  %v1226_v35 = vor.u32 %v1327_v32, %v1223_v33  ;;  %v1141_v36 = vld [vmem:[#allocation7 + $0x40] sm:$0xf]  ;;  %v1138_v53 = vor.u32 %v1305_v50, %v1135_v52  ;;  %v1304_v63 = vld [vmem:[#allocation7 + $0x24] sm:$0xf0]  ;;  %v1303_v0 = vld [vmem:[#allocation7 + $0x24] sm:$0xf] }
  0x46   :  { %516 = vmatpush.bf16.msrb.mxu0 %v894_v42  ;;  %v1142_v39 = vor.u32 %v1308_v37, %v1141_v36  ;;  %v1326_v42 = vld [vmem:[#allocation7 + $0xd4] sm:$0xf0]  ;;  %v1127_v2 = vld [vmem:[#allocation7 + $0x28] sm:$0xf0]  ;;  %v1199_v8 = vld [vmem:[#allocation7 + $0xb8] sm:$0xf0] }
  0x47   :  { %530 = vmatpush.bf16.msrb.mxu1 %v1022_v43  ;;  %v1146_v43 = vor.u32 %v1307_v38, %v1143_v40  ;;  %v1214_v46 = vor.u32 %v1326_v42, %v1213_v41  ;;  %v1130_v3 = vor.u32 %v1303_v0, %v1127_v2  ;;  %v1117_v10 = vld [vmem:[#allocation7 + $0x10] sm:$0xf]  ;;  %v1301_v12 = vld [vmem:[#allocation7 + $0x14] sm:$0xf]  ;;  %v1119_v14 = vld [vmem:[#allocation7 + $0x18] sm:$0xf0] }
  0x48   :  { %544 = vmatpush.bf16.msrb.mxu2 %v898_v44  ;;  %v1325_v44 = vld [vmem:[#allocation7 + $0xd4] sm:$0xf]  ;;  %v1122_v15 = vor.u32 %v1301_v12, %v1119_v14  ;;  %v1189_v16 = vld [vmem:[#allocation7 + $0xa0] sm:$0xf]  ;;  %v1319_v18 = vld [vmem:[#allocation7 + $0xa4] sm:$0xf] }
  0x49   :  { %558 = vmatpush.bf16.msrb.mxu3 %v1026_v48  ;;  %v1218_v47 = vor.u32 %v1325_v44, %v1215_v45  ;;  %v1133_v48 = vld [vmem:[#allocation7 + $0x30] sm:$0xf]  ;;  %v1109_v21 = vld [vmem:[#allocation7] sm:$0xf]  ;;  %v1299_v22 = vld [vmem:[#allocation7 + $0x4] sm:$0xf] }
  0x4a   :  { %517 = vmatpush.bf16.msrb.mxu0 %v878_v55  ;;  %v1134_v51 = vor.u32 %v1306_v49, %v1133_v48  ;;  %v1205_v55 = vld [vmem:[#allocation7 + $0xc0] sm:$0xf]  ;;  %v1111_v24 = vld [vmem:[#allocation7 + $0x8] sm:$0xf0]  ;;  %v1318_v27 = vld [vmem:[#allocation7 + $0x94] sm:$0xf0] }
  0x4b   :  { %531 = vmatpush.bf16.msrb.mxu1 %v1006_v56  ;;  %v1324_v56 = vld [vmem:[#allocation7 + $0xc4] sm:$0xf0]  ;;  %v1317_v28 = vld [vmem:[#allocation7 + $0x94] sm:$0xf]  ;;  %v1183_v31 = vld [vmem:[#allocation7 + $0x98] sm:$0xf0] }
  0x4c   :  { %545 = vmatpush.bf16.msrb.mxu2 %v882_v58  ;;  %v1323_v58 = vld [vmem:[#allocation7 + $0xc4] sm:$0xf]  ;;  %v1206_v59 = vor.u32 %v1324_v56, %v1205_v55  ;;  %v1186_v33 = vor.u32 %v1317_v28, %v1183_v31  ;;  %v1175_v38 = vld [vmem:[#allocation7 + $0x88] sm:$0xf0] }
  0x4d   :  { %559 = vmatpush.bf16.msrb.mxu3 %v1010_v62  ;;  %v1210_v61 = vor.u32 %v1323_v58, %v1207_v60  ;;  %v1125_v62 = vld [vmem:[#allocation7 + $0x20] sm:$0xf]  ;;  %v1315_v36 = vld [vmem:[#allocation7 + $0x84] sm:$0xf] }
  0x4e   :  { %518 = vmatpush.bf16.msrb.mxu0 %v862_v4  ;;  %v1126_v1 = vor.u32 %v1304_v63, %v1125_v62  ;;  %v1197_v4 = vld [vmem:[#allocation7 + $0xb0] sm:$0xf] }
  0x4f   :  { %532 = vmatpush.bf16.msrb.mxu1 %v990_v5  ;;  %v1322_v5 = vld [vmem:[#allocation7 + $0xb4] sm:$0xf0] }
  0x50   :  { %546 = vmatpush.bf16.msrb.mxu2 %v866_v6  ;;  %v1321_v6 = vld [vmem:[#allocation7 + $0xb4] sm:$0xf] }
  0x51   :  { %560 = vmatpush.bf16.msrb.mxu3 %v994_v7  ;;  %519 = vmatmul.bf16.vlgmr.msrb.gmra.mxu0 %v1489_v54  ;;  %v1198_v7 = vor.u32 %v1322_v5, %v1197_v4  ;;  %v1202_v9 = vor.u32 %v1321_v6, %v1199_v8  ;;  %v605_v6 = vld [vmem:[%s1513_s3] sm:$0x3]  ;;  %s835_s3 = sshll.u32 %s1448_s7, 4  ;;  %s836_s3 = int_to_ptr.vmem [resolvable:$true] %s835_s3 }
  0x52   :  { %533 = vmatmul.bf16.vlgmr.msrb.gmra.mxu1 %v1491_v57  ;;  %771 = vmatpush.bf16.msra.mxu0 %v1166_v11  ;;  %v1302_v11 = vld [vmem:[#allocation7 + $0x14] sm:$0xf0]  ;;  %v607_v8 = vperm.slane %v605_v6, 0 }
  0x53   :  { %547 = vmatmul.bf16.vlgmr.msrb.gmra.mxu2 %v1489_v54  ;;  %v1330_v54 = vld [vmem:[#allocation7 + $0xf4] sm:$0xf0] }
  0x54   :  { %561 = vmatmul.bf16.vlgmr.msrb.gmra.mxu3 %v1491_v57  ;;  %799 = vmatpush.bf16.msra.mxu2 %v1170_v13  ;;  %v1230_v57 = vor.u32 %v1330_v54, %v1229_v20  ;;  %v1118_v13 = vor.u32 %v1302_v11, %v1117_v10  ;;  %v1191_v20 = vld [vmem:[#allocation7 + $0xa8] sm:$0xf0] }
  0x55   :  { %813 = vmatpush.bf16.msra.mxu3 %v1234_v25  ;;  %v1194_v54 = vor.u32 %v1319_v18, %v1191_v20  ;;  %v1114_v25 = vor.u32 %v1299_v22, %v1111_v24 }
  0x56   :  { %772 = vmatpush.bf16.msra.mxu0 %v1158_v17  ;;  %785 = vmatpush.bf16.msra.mxu1 %v1230_v57  ;;  %v1320_v17 = vld [vmem:[#allocation7 + $0xa4] sm:$0xf0] }
  0x57   :  { %v1300_v57 = vld [vmem:[#allocation7 + $0x4] sm:$0xf0] }
  0x58   :  { %800 = vmatpush.bf16.msra.mxu2 %v1162_v19  ;;  %v1190_v19 = vor.u32 %v1320_v17, %v1189_v16  ;;  %v1110_v23 = vor.u32 %v1300_v57, %v1109_v21 }
  0x59   :  { %814 = vmatpush.bf16.msra.mxu3 %v1226_v35  ;;  %v1316_v35 = vld [vmem:[#allocation7 + $0x84] sm:$0xf0] }
  0x5a   :  { %773 = vmatpush.bf16.msra.mxu0 %v1150_v26  ;;  %786 = vmatpush.bf16.msra.mxu1 %v1222_v34  ;;  %v1181_v26 = vld [vmem:[#allocation7 + $0x90] sm:$0xf]  ;;  %v1173_v34 = vld [vmem:[#allocation7 + $0x80] sm:$0xf] }
  0x5b   :  { %v1174_v37 = vor.u32 %v1316_v35, %v1173_v34 }
  0x5c   :  { %801 = vmatpush.bf16.msra.mxu2 %v1154_v30  ;;  %v1182_v30 = vor.u32 %v1318_v27, %v1181_v26 }
  0x5d   :  { %815 = vmatpush.bf16.msra.mxu3 %v1218_v47 }
  0x5e   :  { %774 = vmatpush.bf16.msra.mxu0 %v1142_v39  ;;  %787 = vmatpush.bf16.msra.mxu1 %v1214_v46  ;;  %v1178_v39 = vor.u32 %v1315_v36, %v1175_v38 }
  0x60   :  { %802 = vmatpush.bf16.msra.mxu2 %v1146_v43 }
  0x61   :  { %816 = vmatpush.bf16.msra.mxu3 %v1210_v61 }
  0x62   :  { %775 = vmatpush.bf16.msra.mxu0 %v1134_v51  ;;  %788 = vmatpush.bf16.msra.mxu1 %v1206_v59 }
  0x64   :  { %803 = vmatpush.bf16.msra.mxu2 %v1138_v53 }
  0x65   :  { %817 = vmatpush.bf16.msra.mxu3 %v1202_v9 }
  0x66   :  { %776 = vmatpush.bf16.msra.mxu0 %v1126_v1  ;;  %789 = vmatpush.bf16.msra.mxu1 %v1198_v7 }
  0x68   :  { %804 = vmatpush.bf16.msra.mxu2 %v1130_v3 }
  0x69   :  { %818 = vmatpush.bf16.msra.mxu3 %v1194_v54 }
  0x6a   :  { %777 = vmatpush.bf16.msra.mxu0 %v1118_v13  ;;  %790 = vmatpush.bf16.msra.mxu1 %v1190_v19  ;;  %v608_v13 = vperm.slane %v605_v6, 1 }
  0x6c   :  { %805 = vmatpush.bf16.msra.mxu2 %v1122_v15 }
  0x6d   :  { %819 = vmatpush.bf16.msra.mxu3 %v1186_v33 }
  0x6e   :  { %778 = vmatpush.bf16.msra.mxu0 %v1110_v23  ;;  %791 = vmatpush.bf16.msra.mxu1 %v1182_v30 }
  0x70   :  { %806 = vmatpush.bf16.msra.mxu2 %v1114_v25 }
  0x71   :  { %820 = vmatpush.bf16.msra.mxu3 %v1178_v39 }
  0x72   :  { %792 = vmatpush.bf16.msra.mxu1 %v1174_v37 }
  0xae   :  { %v464_v29 = vpop.f32.mrf.mxu0 }
  0xaf   :  { %v478_v32 = vpop.f32.mrf.mxu1 }
  0xb0   :  { %v479_v53 = vadd.f32 %v478_v32, %v464_v29 }
  0xb6   :  { %v492_v40 = vpop.f32.mrf.mxu2  ;;  %v466_v42 = vpop.f32.mrf.mxu0 }
  0xb7   :  { %v506_v41 = vpop.f32.mrf.mxu3  ;;  %v480_v43 = vpop.f32.mrf.mxu1 }
  0xb8   :  { %v481_v55 = vadd.f32 %v480_v43, %v466_v42  ;;  %v507_v0 = vadd.f32 %v506_v41, %v492_v40 }
  0xbe   :  { %v494_v44 = vpop.f32.mrf.mxu2 }
  0xbf   :  { %v508_v45 = vpop.f32.mrf.mxu3 }
  0xc0   :  { %v509_v1 = vadd.f32 %v508_v45, %v494_v44 }
  0xce   :  { %v520_v46 = vpop.f32.mrf.mxu0 }
  0xcf   :  { %v534_v47 = vpop.f32.mrf.mxu1 }
  0xd0   :  { %v535_v49 = vadd.f32 %v534_v47, %v520_v46 }
  0xd2   :  { %v567_v58 = vmul.f32 %v535_v49, %v479_v53 }
  0xd6   :  { %v548_v48 = vpop.f32.mrf.mxu2  ;;  %v522_v51 = vpop.f32.mrf.mxu0 }
  0xd7   :  { %v562_v50 = vpop.f32.mrf.mxu3  ;;  %v536_v52 = vpop.f32.mrf.mxu1 }
  0xd8   :  { %v537_v56 = vadd.f32 %v536_v52, %v522_v51  ;;  %v563_v61 = vadd.f32 %v562_v50, %v548_v48 }
  0xda   :  { %v569_v59 = vmul.f32 %v537_v56, %v481_v55  ;;  %v568_v3 = vmul.f32 %v563_v61, %v507_v0 }
  0xdc   :  { %v571_v60 = vpack.c.bf16 %v569_v59, %v567_v58 }
  0xde   :  { %v550_v62 = vpop.f32.mrf.mxu2  ;;  %779 = vmatmul.bf16.vlgmr.msra.gmra.mxu0 %v571_v60  ;;  %807 = vmatmul.bf16.vlgmr.msra.gmra.mxu2 %v571_v60 }
  0xdf   :  { %v564_v63 = vpop.f32.mrf.mxu3 }
  0xe0   :  { %v565_v2 = vadd.f32 %v564_v63, %v550_v62 }
  0xe2   :  { %v570_v4 = vmul.f32 %v565_v2, %v509_v1 }
  0xe4   :  { %v572_v5 = vpack.c.bf16 %v570_v4, %v568_v3 }
  0xe6   :  { %793 = vmatmul.bf16.vlgmr.msra.gmra.mxu1 %v572_v5  ;;  %821 = vmatmul.bf16.vlgmr.msra.gmra.mxu3 %v572_v5 }
 0x15b   :  { %v780_v7 = vpop.f32.mrf.mxu0 }
 0x15c   :  { %v781_v9 = vadd.f32 %v780_v7, %v607_v8 }
 0x161   :  { %v808_v11 = vpop.f32.mrf.mxu2 }
 0x162   :  { %v809_v15 = vadd.f32 %v808_v11, %v608_v13 }
 0x163   :  { %v794_v10 = vpop.f32.mrf.mxu1  ;;  %v782_v14 = vpop.f32.mrf.mxu0 }
 0x164   :  { %v795_v12 = vadd.f32 %v794_v10, %v781_v9  ;;  %v783_v17 = vadd.f32 %v782_v14, %v607_v8 }
 0x166   :  { %827 = vst [vmem:[#allocation8] sm:$0xff] %v795_v12 }
 0x169   :  { %v822_v16 = vpop.f32.mrf.mxu3  ;;  %v810_v54 = vpop.f32.mrf.mxu2 }
 0x16a   :  { %v823_v18 = vadd.f32 %v822_v16, %v809_v15  ;;  %v811_v21 = vadd.f32 %v810_v54, %v608_v13 }
 0x16b   :  { %v796_v19 = vpop.f32.mrf.mxu1 }
 0x16c   :  { %828 = vst [vmem:[#allocation8 + $0x8] sm:$0xff] %v823_v18  ;;  %v797_v20 = vadd.f32 %v796_v19, %v783_v17 }
 0x16e   :  { %829 = vst [vmem:[#allocation8 + $0x10] sm:$0xff] %v797_v20 }
 0x171   :  { %v824_v57 = vpop.f32.mrf.mxu3 }
 0x172   :  { %v825_v22 = vadd.f32 %v824_v57, %v811_v21 }
 0x174   :  { %830 = vst [vmem:[#allocation8 + $0x18] sm:$0xff] %v825_v22 }
 0x175   :  { %843 = dma.vmem_to_hbm [thread:$0]  %s836_s3, 512, %s838_s10, [#allocation4], %s1442_s23, %s1442_s23, %s1443_s24  }
 0x176   :  { %1439 = dma.done.wait [#allocation4], 512  }
 0x177   :  { %1440 = vsyncadd [#allocation4], 4294966784 }
 0x178   :  { %848 = vsyncpa [#allocation3], 1 }
 0x179   :  { %849 = vsyncpa [#allocation6], 1 }
 0x17a   :  { %850 = vsyncpa [#allocation4], 1 }

</bundles_post_ra>
